<compile_context>
chip_gen: v7x
topology: tpu7x:2x2x1
jax: 0.10.0
libtpu: 0.0.40
codegen_flags: <defaults>
</compile_context>

<pallas_src>
import jax
import jax.numpy as jnp
from jax.experimental import pallas as pl
from jax.experimental.pallas import tpu as pltpu


def _round_up(v, m):
    return ((v + m - 1) // m) * m


def _divisor_tiles(n128):
    """All multiples of 128 that evenly divide n128 (itself a multiple of 128)."""
    m = n128 // 128
    return sorted(128 * d for d in range(1, m + 1) if m % d == 0)


def _pick_row_tile(target, n128):
    tiles = _divisor_tiles(n128)
    max_tiles = n128 // 128
    for want in (4, 2, 1):            # prefer >= 4 row tiles (v7x has 2 TCs)
        if max_tiles < want:
            continue
        cands = [t for t in tiles if t <= target and n128 // t >= want]
        if cands:
            return max(cands)
    return 128


def _pick_k_tile(target, n128):
    cands = [t for t in _divisor_tiles(n128) if t <= target]
    return max(cands) if cands else 128


def graphsage_layer(x, adj, weight, bias, *, compute_dtype=jnp.bfloat16,
                    tm_target=512, tk_target=2048, xagg_invariant=None,
                    vmem_budget=44 * 1024 * 1024):
    """x: [N, F], adj: [N, N], weight: [O, 2F] (PyTorch nn.Linear layout),
    bias: [O].  Returns [N, O] in x.dtype.

    compute_dtype only affects the adj / x aggregation streams; the
    self-feature branch, weights, bias and all accumulation stay f32.
    """
    N, F = x.shape
    O = weight.shape[0]
    assert weight.shape == (O, 2 * F)
    assert adj.shape == (N, N)

    c_dt = jnp.dtype(compute_dtype)
    out_dt = x.dtype
    c_isz = c_dt.itemsize
    out_isz = jnp.dtype(out_dt).itemsize

    # ---- padded logical sizes (lane-dense, (8,128)-aligned) ----
    n128 = _round_up(N, 128)
    Fp = _round_up(F, 128)
    Op = _round_up(O, 128)

    TM = _pick_row_tile(tm_target, n128)   # adj / output row tile
    TK = _pick_k_tile(tk_target, n128)     # contraction tile over N

    # x_agg grid-invariant (single DMA for the whole grid) when the slab is small.
    if xagg_invariant is None:
        xagg_invariant = n128 * Fp * c_isz <= 8 * 1024 * 1024

    def vmem_need(tm, tk):
        return (2 * tm * tk * c_isz                                   # adj (double buf)
                + 2 * (n128 if xagg_invariant else tk) * Fp * c_isz   # x_agg
                + 2 * tm * Fp * 4                                     # x_self (f32)
                + 2 * 2 * Fp * Op * 4                                 # W_self, W_neigh
                + 2 * 8 * Op * 4                                      # bias (padded)
                + 2 * tm * Op * out_isz                               # out tile
                + tm * Op * 4 + tm * Fp * 4)                          # accumulators

    # Shrink tiles if the estimate would not fit the (v7x-safe) budget.
    tiles = _divisor_tiles(n128)
    while vmem_need(TM, TK) > vmem_budget and (TM > 128 or TK > 128):
        if TK >= TM and TK > 128:
            TK = max(t for t in tiles if t < TK)
        elif TM > 128:
            TM = max(t for t in tiles if t < TM)
        else:
            break

    # ---- operand prep: avoid materializing a padded adj copy when possible ----
    if N == n128:
        adj_in = adj if adj.dtype == c_dt else adj.astype(c_dt)
    else:
        adj_in = jnp.zeros((n128, n128), c_dt).at[:N, :N].set(adj.astype(c_dt))

    # x_self stays f32 (exact self branch); x_agg uses the compute dtype.
    x_self = jnp.zeros((n128, Fp), jnp.float32).at[:N, :F].set(
        x.astype(jnp.float32))
    if c_dt == jnp.dtype(jnp.float32):
        x_agg = x_self
    else:
        x_agg = jnp.zeros((n128, Fp), c_dt).at[:N, :F].set(x.astype(c_dt))

    # Split nn.Linear weight [O, 2F] into transposed halves [Fp, Op] (f32).
    w_self = jnp.zeros((Fp, Op), jnp.float32).at[:F, :O].set(
        weight[:, :F].T.astype(jnp.float32))
    w_neigh = jnp.zeros((Fp, Op), jnp.float32).at[:F, :O].set(
        weight[:, F:].T.astype(jnp.float32))
    b_p = jnp.zeros((1, Op), jnp.float32).at[:, :O].set(
        bias.astype(jnp.float32))

    grid = (n128 // TM, n128 // TK)
    num_k = grid[1]

    def kernel(adj_ref, xagg_ref, xself_ref, ws_ref, wn_ref, b_ref,
               out_ref, acc_out, acc_neigh):
        k = pl.program_id(1)
        if xagg_invariant:
            xk = xagg_ref[pl.ds(pl.multiple_of(k * TK, TK), TK), :]
        else:
            xk = xagg_ref[...]

        # One MXU matmul per grid step on the dominant (adj) stream.
        psum = jnp.dot(adj_ref[...], xk, preferred_element_type=jnp.float32)

        @pl.when(k == 0)
        def _init():
            # Self branch (+ bias) once per row tile, overlapping the next adj
            # DMA; first neighbor product is a direct write (no zero-fill).
            acc_out[...] = jnp.dot(xself_ref[...], ws_ref[...],
                                   preferred_element_type=jnp.float32) + b_ref[...]
            acc_neigh[...] = psum

        @pl.when(k > 0)
        def _accumulate():
            acc_neigh[...] = acc_neigh[...] + psum

        @pl.when(k == num_k - 1)
        def _finalize():
            out = acc_out[...] + jnp.dot(acc_neigh[...], wn_ref[...],
                                         preferred_element_type=jnp.float32)
            # activation is None (module default); dropout is identity in eval.
            # TODO(synk): training-mode dropout (p=0.5) RNG mask omitted.
            out_ref[...] = out.astype(out_ref.dtype)

    if xagg_invariant:
        xagg_spec = pl.BlockSpec((n128, Fp), lambda i, k: (0, 0))
    else:
        xagg_spec = pl.BlockSpec((TK, Fp), lambda i, k: (k, 0))

    vmem_limit = int(min(48 * 1024 * 1024,
                         max(vmem_need(TM, TK) + 4 * 1024 * 1024,
                             16 * 1024 * 1024)))

    out_p = pl.pallas_call(
        kernel,
        out_shape=jax.ShapeDtypeStruct((n128, Op), out_dt),
        grid_spec=pltpu.PrefetchScalarGridSpec(
            num_scalar_prefetch=0,
            grid=grid,
            in_specs=[
                pl.BlockSpec((TM, TK), lambda i, k: (i, k)),    # adj tile
                xagg_spec,                                      # x (aggregation)
                pl.BlockSpec((TM, Fp), lambda i, k: (i, 0)),    # x (self, f32)
                pl.BlockSpec((Fp, Op), lambda i, k: (0, 0)),    # W_self (invariant)
                pl.BlockSpec((Fp, Op), lambda i, k: (0, 0)),    # W_neigh (invariant)
                pl.BlockSpec((1, Op), lambda i, k: (0, 0)),     # bias (invariant)
            ],
            out_specs=pl.BlockSpec((TM, Op), lambda i, k: (i, 0)),
            scratch_shapes=[pltpu.VMEM((TM, Op), jnp.float32),   # self + bias acc
                            pltpu.VMEM((TM, Fp), jnp.float32)],  # neighbor acc
        ),
        compiler_params=pltpu.CompilerParams(
            dimension_semantics=("parallel", "arbitrary"),
            vmem_limit_bytes=vmem_limit,
        ),
    )(adj_in, x_agg, x_self, w_self, w_neigh, b_p)

    # Strip the padding back to the logical shape.
    return out_p[:N, :O]


def graphsage_reference(x, adj, weight, bias):
    neigh = adj @ x
    concat = jnp.concatenate([x, neigh], axis=1)
    return concat @ weight.T + bias


def _make_inputs(key, n, f, o):
    k1, k2, k3, k4 = jax.random.split(key, 4)
    x = jax.random.normal(k1, (n, f), dtype=jnp.float32)
    adj_raw = (jax.random.uniform(k2, (n, n)) > 0.5).astype(jnp.float32)
    adj = adj_raw / jnp.maximum(adj_raw.sum(axis=1, keepdims=True), 1.0)
    weight = jax.random.normal(k3, (o, 2 * f), dtype=jnp.float32) * 0.1
    bias = jax.random.normal(k4, (o,), dtype=jnp.float32) * 0.1
    return x, adj, weight, bias


if __name__ == "__main__":
    key = jax.random.PRNGKey(0)
    kA, kB = jax.random.split(key)

    # Module-scale test: N=16 nodes, in_features=8, out_features=32.
    x, adj, weight, bias = _make_inputs(kA, 16, 8, 32)
    ref = graphsage_reference(x, adj, weight, bias)

    out_f32 = jax.block_until_ready(
        graphsage_layer(x, adj, weight, bias, compute_dtype=jnp.float32))
    assert out_f32.shape == (16, 32)
    assert jnp.allclose(out_f32, ref, atol=1e-5, rtol=1e-5), "f32 mismatch vs reference"

    # Default path: bf16 adj / x_agg streams, exact f32 self branch.
    out_bf16 = jax.block_until_ready(graphsage_layer(x, adj, weight, bias))
    assert jnp.allclose(out_bf16, ref, atol=5e-2, rtol=5e-2), "bf16 mismatch vs reference"

    # Larger non-128-multiple graph: exercises edge padding, multiple row
    # tiles (parallel axis), k-accumulation, and both x_agg layouts.
    x2, adj2, weight2, bias2 = _make_inputs(kB, 300, 40, 72)
    ref2 = graphsage_reference(x2, adj2, weight2, bias2)

    out2 = jax.block_until_ready(
        graphsage_layer(x2, adj2, weight2, bias2, compute_dtype=jnp.float32,
                        tm_target=128, tk_target=128))
    assert out2.shape == (300, 72)
    assert jnp.allclose(out2, ref2, atol=2e-3, rtol=2e-3), "padded f32 mismatch"

    out3 = jax.block_until_ready(
        graphsage_layer(x2, adj2, weight2, bias2, compute_dtype=jnp.float32,
                        tm_target=128, tk_target=128, xagg_invariant=False))
    assert jnp.allclose(out3, ref2, atol=2e-3, rtol=2e-3), "tiled x_agg mismatch"

    print("KERNEL_OK")
</pallas_src>

<mosaic_0001>
module attributes {stable_mosaic.version = 11 : i64} {
  func.func @kernel(%arg0: i32, %arg1: i32, %arg2: memref<128x128xf32, #tpu.memory_space<vmem>>, %arg3: memref<128x128xf32, #tpu.memory_space<vmem>>, %arg4: memref<128x128xf32, #tpu.memory_space<vmem>>, %arg5: memref<128x128xf32, #tpu.memory_space<vmem>>, %arg6: memref<128x128xf32, #tpu.memory_space<vmem>>, %arg7: memref<1x128xf32, #tpu.memory_space<vmem>>, %arg8: memref<128x128xf32, #tpu.memory_space<vmem>>, %arg9: memref<128x128xf32, #tpu.memory_space<vmem>>, %arg10: memref<128x128xf32, #tpu.memory_space<vmem>>) attributes {dimension_semantics = [#tpu.dimension_semantics<parallel>, #tpu.dimension_semantics<arbitrary>], iteration_bounds = array<i64: 1, 1>, scalar_prefetch = 0 : i64, scratch_operands = 2 : i64, tpu.core_type = #tpu.core_type<tc>, window_params = [{transform_indices = @transform_0, window_bounds = array<i64: 128, 128>}, {pipeline_mode = #tpu.pipeline_mode<synchronous>, transform_indices = @transform_1, window_bounds = array<i64: 128, 128>}, {transform_indices = @transform_2, window_bounds = array<i64: 128, 128>}, {pipeline_mode = #tpu.pipeline_mode<synchronous>, transform_indices = @transform_3, window_bounds = array<i64: 128, 128>}, {pipeline_mode = #tpu.pipeline_mode<synchronous>, transform_indices = @transform_4, window_bounds = array<i64: 128, 128>}, {pipeline_mode = #tpu.pipeline_mode<synchronous>, transform_indices = @transform_5, window_bounds = array<i64: 1, 128>}, {transform_indices = @transform_6, window_bounds = array<i64: 128, 128>}]} {
    %c128_i32 = arith.constant 128 : i32
    %0 = arith.muli %arg1, %c128_i32 : i32
    %1 = tpu.assume_multiple %0, 128 : i32
    %2 = arith.index_cast %1 : i32 to index
    %c0 = arith.constant 0 : index
    %3 = vector.load %arg3[%2, %c0] : memref<128x128xf32, #tpu.memory_space<vmem>>, vector<128x128xf32>
    %c0_0 = arith.constant 0 : index
    %c0_1 = arith.constant 0 : index
    %4 = vector.load %arg2[%c0_0, %c0_1] : memref<128x128xf32, #tpu.memory_space<vmem>>, vector<128x128xf32>
    %cst = arith.constant dense<0.000000e+00> : vector<128x128xf32>
    %5 = tpu.matmul %4, %3, %cst {dimension_numbers = #tpu.dot_dimension_numbers<[1], [0], [0], [1], [0, 0, 1, 1], [], []>} : vector<128x128xf32>, vector<128x128xf32>, vector<128x128xf32> -> vector<128x128xf32>
    %c0_i32 = arith.constant 0 : i32
    %6 = arith.cmpi eq, %arg1, %c0_i32 : i32
    %7 = arith.extui %6 : i1 to i32
    %c0_i32_2 = arith.constant 0 : i32
    %8 = arith.cmpi ne, %7, %c0_i32_2 : i32
    scf.if %8 {
      %c0_7 = arith.constant 0 : index
      %c0_8 = arith.constant 0 : index
      %15 = vector.load %arg4[%c0_7, %c0_8] : memref<128x128xf32, #tpu.memory_space<vmem>>, vector<128x128xf32>
      %c0_9 = arith.constant 0 : index
      %c0_10 = arith.constant 0 : index
      %16 = vector.load %arg5[%c0_9, %c0_10] : memref<128x128xf32, #tpu.memory_space<vmem>>, vector<128x128xf32>
      %cst_11 = arith.constant dense<0.000000e+00> : vector<128x128xf32>
      %17 = tpu.matmul %15, %16, %cst_11 {dimension_numbers = #tpu.dot_dimension_numbers<[1], [0], [0], [1], [0, 0, 1, 1], [], []>} : vector<128x128xf32>, vector<128x128xf32>, vector<128x128xf32> -> vector<128x128xf32>
      %c0_12 = arith.constant 0 : index
      %c0_13 = arith.constant 0 : index
      %18 = vector.load %arg7[%c0_12, %c0_13] : memref<1x128xf32, #tpu.memory_space<vmem>>, vector<1x128xf32>
      %19 = vector.broadcast %18 : vector<1x128xf32> to vector<128x128xf32>
      %20 = arith.addf %17, %19 : vector<128x128xf32>
      %c0_14 = arith.constant 0 : index
      %c0_15 = arith.constant 0 : index
      %21 = vector.load %arg9[%c0_14, %c0_15] : memref<128x128xf32, #tpu.memory_space<vmem>>, vector<128x128xf32>
      tpu.vector_store %arg9[%c0_14, %c0_15], %20 {strides = array<i32>} : memref<128x128xf32, #tpu.memory_space<vmem>>, vector<128x128xf32>,
      %c0_16 = arith.constant 0 : index
      %c0_17 = arith.constant 0 : index
      %22 = vector.load %arg10[%c0_16, %c0_17] : memref<128x128xf32, #tpu.memory_space<vmem>>, vector<128x128xf32>
      tpu.vector_store %arg10[%c0_16, %c0_17], %5 {strides = array<i32>} : memref<128x128xf32, #tpu.memory_space<vmem>>, vector<128x128xf32>,
    } else {
    }
    %c0_i32_3 = arith.constant 0 : i32
    %9 = arith.cmpi sgt, %arg1, %c0_i32_3 : i32
    %10 = arith.extui %9 : i1 to i32
    %c0_i32_4 = arith.constant 0 : i32
    %11 = arith.cmpi ne, %10, %c0_i32_4 : i32
    scf.if %11 {
      %c0_7 = arith.constant 0 : index
      %c0_8 = arith.constant 0 : index
      %15 = vector.load %arg10[%c0_7, %c0_8] : memref<128x128xf32, #tpu.memory_space<vmem>>, vector<128x128xf32>
      %16 = arith.addf %15, %5 : vector<128x128xf32>
      %c0_9 = arith.constant 0 : index
      %c0_10 = arith.constant 0 : index
      %17 = vector.load %arg10[%c0_9, %c0_10] : memref<128x128xf32, #tpu.memory_space<vmem>>, vector<128x128xf32>
      tpu.vector_store %arg10[%c0_9, %c0_10], %16 {strides = array<i32>} : memref<128x128xf32, #tpu.memory_space<vmem>>, vector<128x128xf32>,
    } else {
    }
    %c0_i32_5 = arith.constant 0 : i32
    %12 = arith.cmpi eq, %arg1, %c0_i32_5 : i32
    %13 = arith.extui %12 : i1 to i32
    %c0_i32_6 = arith.constant 0 : i32
    %14 = arith.cmpi ne, %13, %c0_i32_6 : i32
    scf.if %14 {
      %c0_7 = arith.constant 0 : index
      %c0_8 = arith.constant 0 : index
      %15 = vector.load %arg9[%c0_7, %c0_8] : memref<128x128xf32, #tpu.memory_space<vmem>>, vector<128x128xf32>
      %c0_9 = arith.constant 0 : index
      %c0_10 = arith.constant 0 : index
      %16 = vector.load %arg10[%c0_9, %c0_10] : memref<128x128xf32, #tpu.memory_space<vmem>>, vector<128x128xf32>
      %c0_11 = arith.constant 0 : index
      %c0_12 = arith.constant 0 : index
      %17 = vector.load %arg6[%c0_11, %c0_12] : memref<128x128xf32, #tpu.memory_space<vmem>>, vector<128x128xf32>
      %cst_13 = arith.constant dense<0.000000e+00> : vector<128x128xf32>
      %18 = tpu.matmul %16, %17, %cst_13 {dimension_numbers = #tpu.dot_dimension_numbers<[1], [0], [0], [1], [0, 0, 1, 1], [], []>} : vector<128x128xf32>, vector<128x128xf32>, vector<128x128xf32> -> vector<128x128xf32>
      %19 = arith.addf %15, %18 : vector<128x128xf32>
      %c0_14 = arith.constant 0 : index
      %c0_15 = arith.constant 0 : index
      %20 = vector.load %arg8[%c0_14, %c0_15] : memref<128x128xf32, #tpu.memory_space<vmem>>, vector<128x128xf32>
      tpu.vector_store %arg8[%c0_14, %c0_15], %19 {strides = array<i32>} : memref<128x128xf32, #tpu.memory_space<vmem>>, vector<128x128xf32>,
    } else {
    }
    return
  }
  func.func @transform_0(%arg0: i32, %arg1: i32) -> (i32, i32) {
    %c0_i32 = arith.constant 0 : i32
    return %arg0, %arg1 : i32, i32
  }
  func.func @transform_1(%arg0: i32, %arg1: i32) -> (i32, i32) {
    %c0_i32 = arith.constant 0 : i32
    %c0_i32_0 = arith.constant 0 : i32
    %c0_i32_1 = arith.constant 0 : i32
    return %c0_i32, %c0_i32_0 : i32, i32
  }
  func.func @transform_2(%arg0: i32, %arg1: i32) -> (i32, i32) {
    %c0_i32 = arith.constant 0 : i32
    %c0_i32_0 = arith.constant 0 : i32
    return %arg0, %c0_i32 : i32, i32
  }
  func.func @transform_3(%arg0: i32, %arg1: i32) -> (i32, i32) {
    %c0_i32 = arith.constant 0 : i32
    %c0_i32_0 = arith.constant 0 : i32
    %c0_i32_1 = arith.constant 0 : i32
    return %c0_i32, %c0_i32_0 : i32, i32
  }
  func.func @transform_4(%arg0: i32, %arg1: i32) -> (i32, i32) {
    %c0_i32 = arith.constant 0 : i32
    %c0_i32_0 = arith.constant 0 : i32
    %c0_i32_1 = arith.constant 0 : i32
    return %c0_i32, %c0_i32_0 : i32, i32
  }
  func.func @transform_5(%arg0: i32, %arg1: i32) -> (i32, i32) {
    %c0_i32 = arith.constant 0 : i32
    %c0_i32_0 = arith.constant 0 : i32
    %c0_i32_1 = arith.constant 0 : i32
    return %c0_i32, %c0_i32_0 : i32, i32
  }
  func.func @transform_6(%arg0: i32, %arg1: i32) -> (i32, i32) {
    %c0_i32 = arith.constant 0 : i32
    %c0_i32_0 = arith.constant 0 : i32
    return %arg0, %c0_i32 : i32, i32
  }
}

</mosaic_0001>

<bundles_post_ra>
// kernel: tpu_custom_call.1
= control target key start
LH: loop header
LB: loop body
LE: loop exit
PB: predicated region body
PF: predicated region fallthrough
CT: control target
= control target key end

     0   :  { %11 = vsyncpa [#allocation5], 0  ;;  %s1497_s0 = inlined_call_operand.hbm [shape: f32[128,128], index: 0, kind: input, shape index: {}]   ;;  %s1498_s1 = inlined_call_operand.hbm [shape: f32[128,128], index: 1, kind: input, shape index: {}]   ;;  %s1499_s2 = inlined_call_operand.hbm [shape: f32[128,128], index: 2, kind: input, shape index: {}]   ;;  %s1500_s3 = inlined_call_operand.hbm [shape: f32[128,128], index: 3, kind: input, shape index: {}]   ;;  %s1501_s4 = inlined_call_operand.hbm [shape: f32[128,128], index: 4, kind: input, shape index: {}]   ;;  %s1502_s5 = inlined_call_operand.vmem [shape: f32[1,128], index: 5, kind: input, shape index: {}]   ;;  %s1503_s6 = inlined_call_operand.hbm [shape: f32[128,128], index: 6, kind: output, shape index: {}]  }
   0x1   :  { %12 = vsyncpa [#allocation8], 0 }
   0x2   :  { %13 = vsyncpa [#allocation11], 0 }
   0x3   :  { %14 = vsyncpa [#allocation6], 0  ;;  %s1347_s21 = smov [#allocation7]   ;;  %s1348_s23 = smov [#allocation10]  }
   0x4   :  { %s32_s22 = sshll.u32 %s1347_s21, 4  ;;  %s56_s24 = sshll.u32 %s1348_s23, 4  ;;  %s33_s22 = int_to_ptr.vmem [resolvable:$true] %s32_s22  ;;  %s1390_s24 = int_to_ptr.vmem [resolvable:$true] %s56_s24 }
   0x5   :  { %s1207_s27 = scalar_lea.hbm %s1498_s1, 2048 }
   0x6   :  { %p1208_p0 = scmp.ne.s32.totalorder %s1498_s1, %s1207_s27  ;;  %p1211_p1 = scmp.lt.u32.totalorder %s1207_s27, %s1498_s1 }
   0x8   :  { %p1213_p2 = pnand %p1211_p1, %p1208_p0 }
   0xa   :  { %1216 = shalt.err (!%p1213_p2)
}
   0xb   :  { %s1217_s8 = scalar_lea.vmem %s33_s22, 2048  ;;  %p1222_p4 = scmp.lt.s32.totalorder %s33_s22, %s33_s22 }
   0xc   :  { %p1218_p3 = scmp.ne.s32.totalorder %s33_s22, %s1217_s8  ;;  %p1223_p5 = scmp.lt.s32.totalorder %s1217_s8, %s1217_s8 }
   0xe   :  { %p1224_p6 = por %p1223_p5, %p1222_p4 }
  0x10   :  { %p1225_p7 = pnand %p1224_p6, %p1218_p3 }
  0x12   :  { %1228 = shalt.err (!%p1225_p7)
}
  0x13   :  { %s1349_s9 = smov 128   ;;  %s1350_s10 = smov 8  }
  0x14   :  { %38 = dma.hbm_to_vmem [thread:$0]  %s1498_s1, 2048, %s33_s22, [#allocation8], %s1349_s9, %s1349_s9, %s1350_s10  }
  0x15   :  { %s1229_s15 = scalar_lea.hbm %s1500_s3, 2048 }
  0x16   :  { %p1230_p8 = scmp.ne.s32.totalorder %s1500_s3, %s1229_s15  ;;  %p1233_p9 = scmp.lt.u32.totalorder %s1229_s15, %s1500_s3 }
  0x18   :  { %p1235_p10 = pnand %p1233_p9, %p1230_p8 }
  0x1a   :  { %1238 = shalt.err (!%p1235_p10)
}
  0x1b   :  { %s1239_s20 = scalar_lea.vmem %s1390_s24, 2048  ;;  %p1244_p12 = scmp.lt.s32.totalorder %s1390_s24, %s1390_s24 }
  0x1c   :  { %p1240_p11 = scmp.ne.s32.totalorder %s1390_s24, %s1239_s20  ;;  %p1245_p13 = scmp.lt.s32.totalorder %s1239_s20, %s1239_s20 }
  0x1e   :  { %p1246_p0 = por %p1245_p13, %p1244_p12 }
  0x20   :  { %p1247_p1 = pnand %p1246_p0, %p1240_p11 }
  0x22   :  { %1250 = shalt.err (!%p1247_p1)
}
  0x23   :  { %62 = dma.hbm_to_vmem [thread:$0]  %s1500_s3, 2048, %s1390_s24, [#allocation11], %s1349_s9, %s1349_s9, %s1350_s10  }
  0x24   :  { %s1351_s22 = smov [#allocation4]   ;;  %s1352_s25 = smov [#allocation9]  }
  0x25   :  { %s20_s23 = sshll.u32 %s1351_s22, 4  ;;  %s44_s26 = sshll.u32 %s1352_s25, 4  ;;  %s21_s23 = int_to_ptr.vmem [resolvable:$true] %s20_s23  ;;  %s1427_s26 = int_to_ptr.vmem [resolvable:$true] %s44_s26 }
  0x26   :  { %s1251_s29 = scalar_lea.hbm %s1497_s0, 2048 }
  0x27   :  { %p1252_p2 = scmp.ne.s32.totalorder %s1497_s0, %s1251_s29  ;;  %p1255_p3 = scmp.lt.u32.totalorder %s1251_s29, %s1497_s0 }
  0x29   :  { %p1257_p4 = pnand %p1255_p3, %p1252_p2 }
  0x2b   :  { %1260 = shalt.err (!%p1257_p4)
}
  0x2c   :  { %s1261_s3 = scalar_lea.vmem %s21_s23, 2048  ;;  %p1266_p6 = scmp.lt.s32.totalorder %s21_s23, %s21_s23 }
  0x2d   :  { %p1262_p5 = scmp.ne.s32.totalorder %s21_s23, %s1261_s3  ;;  %p1267_p7 = scmp.lt.s32.totalorder %s1261_s3, %s1261_s3 }
  0x2f   :  { %p1268_p8 = por %p1267_p7, %p1266_p6 }
  0x31   :  { %p1269_p9 = pnand %p1268_p8, %p1262_p5 }
  0x33   :  { %1272 = shalt.err (!%p1269_p9)
}
  0x34   :  { %26 = dma.hbm_to_vmem [thread:$0]  %s1497_s0, 2048, %s21_s23, [#allocation5], %s1349_s9, %s1349_s9, %s1350_s10  }
  0x35   :  { %s1273_s15 = scalar_lea.hbm %s1499_s2, 2048 }
  0x36   :  { %p1274_p10 = scmp.ne.s32.totalorder %s1499_s2, %s1273_s15  ;;  %p1277_p11 = scmp.lt.u32.totalorder %s1273_s15, %s1499_s2 }
  0x38   :  { %p1279_p12 = pnand %p1277_p11, %p1274_p10 }
  0x3a   :  { %1282 = shalt.err (!%p1279_p12)
}
  0x3b   :  { %s1283_s20 = scalar_lea.vmem %s1427_s26, 2048  ;;  %p1288_p0 = scmp.lt.s32.totalorder %s1427_s26, %s1427_s26 }
  0x3c   :  { %p1284_p13 = scmp.ne.s32.totalorder %s1427_s26, %s1283_s20  ;;  %p1289_p1 = scmp.lt.s32.totalorder %s1283_s20, %s1283_s20 }
  0x3e   :  { %p1290_p2 = por %p1289_p1, %p1288_p0 }
  0x40   :  { %p1291_p3 = pnand %p1290_p2, %p1284_p13 }
  0x42   :  { %1294 = shalt.err (!%p1291_p3)
}
  0x43   :  { %50 = dma.hbm_to_vmem [thread:$0]  %s1499_s2, 2048, %s1427_s26, [#allocation8], %s1349_s9, %s1349_s9, %s1350_s10  }
  0x44   :  { %s1353_s21 = smov [#allocation12]   ;;  %s1295_s27 = scalar_lea.hbm %s1501_s4, 2048 }
  0x45   :  { %s68_s22 = sshll.u32 %s1353_s21, 4  ;;  %p1296_p4 = scmp.ne.s32.totalorder %s1501_s4, %s1295_s27  ;;  %s69_s22 = int_to_ptr.vmem [resolvable:$true] %s68_s22 }
  0x46   :  { %p1299_p5 = scmp.lt.u32.totalorder %s1295_s27, %s1501_s4 }
  0x48   :  { %p1301_p6 = pnand %p1299_p5, %p1296_p4 }
  0x4a   :  { %1304 = shalt.err (!%p1301_p6)
}
  0x4b   :  { %s1305_s8 = scalar_lea.vmem %s69_s22, 2048  ;;  %p1310_p8 = scmp.lt.s32.totalorder %s69_s22, %s69_s22 }
  0x4c   :  { %p1306_p7 = scmp.ne.s32.totalorder %s69_s22, %s1305_s8  ;;  %p1311_p9 = scmp.lt.s32.totalorder %s1305_s8, %s1305_s8 }
  0x4e   :  { %p1312_p10 = por %p1311_p9, %p1310_p8 }
  0x50   :  { %p1313_p11 = pnand %p1312_p10, %p1306_p7 }
  0x52   :  { %1316 = shalt.err (!%p1313_p11)
}
  0x53   :  { %74 = dma.hbm_to_vmem [thread:$0]  %s1501_s4, 2048, %s69_s22, [#allocation11], %s1349_s9, %s1349_s9, %s1350_s10  }
  0x54   :  { %1339 = dma.done.wait [#allocation5], 2048  }
  0x55   :  { %1340 = vsyncadd [#allocation5], 4294965248 }
  0x56   :  { %1341 = dma.done.wait [#allocation8], 4096  }
  0x57   :  { %1342 = vsyncadd [#allocation8], 4294963200 }
  0x58   :  { %1343 = dma.done.wait [#allocation11], 4096  }
  0x59   :  { %1344 = vsyncadd [#allocation11], 4294963200  ;;  %v94_v0 = vld [vmem:[#allocation7] sm:$0xff]  ;;  %v95_v1 = vld [vmem:[#allocation7 + $0x8] sm:$0xff] }
  0x5a   :  { %v96_v2 = vld [vmem:[#allocation7 + $0x10] sm:$0xff]  ;;  %v1055_v3 = vpack.c.bf16 %v95_v1, %v94_v0  ;;  %v97_v4 = vld [vmem:[#allocation7 + $0x18] sm:$0xff]  ;;  %v98_v6 = vld [vmem:[#allocation7 + $0x20] sm:$0xff] }
  0x5b   :  { %v1059_v5 = vpack.c.bf16 %v97_v4, %v96_v2  ;;  %v99_v7 = vld [vmem:[#allocation7 + $0x28] sm:$0xff]  ;;  %v110_v9 = vld [vmem:[#allocation4] sm:$0xff]  ;;  %v100_v10 = vld [vmem:[#allocation7 + $0x30] sm:$0xff] }
  0x5c   :  { %1056 = vmatprep.subr.bf16.mxu0 %v1055_v3  ;;  %v1063_v8 = vpack.c.bf16 %v99_v7, %v98_v6  ;;  %v101_v11 = vld [vmem:[#allocation7 + $0x38] sm:$0xff]  ;;  %919 = vmatprep.mubr.f32.mxu0 %v110_v9  ;;  %v102_v13 = vld [vmem:[#allocation7 + $0x40] sm:$0xff]  ;;  %v103_v14 = vld [vmem:[#allocation7 + $0x48] sm:$0xff] }
  0x5d   :  { %1058 = vmatpush3.bf16.msra.mxu0 %v1055_v3  ;;  %v1067_v12 = vpack.c.bf16 %v101_v11, %v100_v10  ;;  %v291_v15 = vld [vmem:[#allocation10] sm:$0xff]  ;;  %v292_v16 = vld [vmem:[#allocation10 + $0x8] sm:$0xff]  ;;  %v293_v17 = vld [vmem:[#allocation10 + $0x10] sm:$0xff]  ;;  %v1071_v21 = vpack.c.bf16 %v103_v14, %v102_v13 }
  0x5e   :  { %1060 = vmatprep.subr.bf16.mxu0 %v1059_v5  ;;  %v294_v18 = vld [vmem:[#allocation10 + $0x18] sm:$0xff]  ;;  %v1087_v19 = vpack.c.bf16 %v292_v16, %v291_v15  ;;  %v295_v22 = vld [vmem:[#allocation10 + $0x20] sm:$0xff]  ;;  %v296_v23 = vld [vmem:[#allocation10 + $0x28] sm:$0xff] }
  0x5f   :  { %v1091_v20 = vpack.c.bf16 %v294_v18, %v293_v17  ;;  %v104_v24 = vld [vmem:[#allocation7 + $0x50] sm:$0xff]  ;;  %v105_v25 = vld [vmem:[#allocation7 + $0x58] sm:$0xff]  ;;  %v1095_v26 = vpack.c.bf16 %v296_v23, %v295_v22  ;;  %v106_v30 = vld [vmem:[#allocation7 + $0x60] sm:$0xff] }
  0x60   :  { %1088 = vmatprep.subr.bf16.mxu1 %v1087_v19  ;;  %v1075_v27 = vpack.c.bf16 %v105_v25, %v104_v24  ;;  %v297_v28 = vld [vmem:[#allocation10 + $0x30] sm:$0xff]  ;;  %v298_v29 = vld [vmem:[#allocation10 + $0x38] sm:$0xff]  ;;  %v107_v31 = vld [vmem:[#allocation7 + $0x68] sm:$0xff] }
  0x61   :  { %1062 = vmatpush3.bf16.msra.mxu0 %v1059_v5  ;;  %1090 = vmatpush3.bf16.msra.mxu1 %v1087_v19  ;;  %v275_v32 = vld [vmem:[#allocation9] sm:$0xff]  ;;  %v1099_v33 = vpack.c.bf16 %v298_v29, %v297_v28  ;;  %v1079_v34 = vpack.c.bf16 %v107_v31, %v106_v30  ;;  %v300_v36 = vld [vmem:[#allocation10 + $0x48] sm:$0xff]  ;;  %v108_v37 = vld [vmem:[#allocation7 + $0x70] sm:$0xff] }
  0x62   :  { %1064 = vmatprep.subr.bf16.mxu0 %v1063_v8  ;;  %1092 = vmatprep.subr.bf16.mxu1 %v1091_v20  ;;  %v299_v35 = vld [vmem:[#allocation10 + $0x40] sm:$0xff]  ;;  %v109_v38 = vld [vmem:[#allocation7 + $0x78] sm:$0xff]  ;;  %v301_v41 = vld [vmem:[#allocation10 + $0x50] sm:$0xff] }
  0x63   :  { %975 = vmatprep.mubr.f32.mxu1 %v275_v32  ;;  %v1103_v39 = vpack.c.bf16 %v300_v36, %v299_v35  ;;  %v1083_v40 = vpack.c.bf16 %v109_v38, %v108_v37  ;;  %v302_v42 = vld [vmem:[#allocation10 + $0x58] sm:$0xff]  ;;  %v578_v43 = vld [vmem:[#allocation12] sm:$0xff]  ;;  %v579_v44 = vld [vmem:[#allocation12 + $0x8] sm:$0xff] }
  0x64   :  { %v1107_v45 = vpack.c.bf16 %v302_v42, %v301_v41  ;;  %v1119_v46 = vpack.c.bf16 %v579_v44, %v578_v43  ;;  %v580_v47 = vld [vmem:[#allocation12 + $0x10] sm:$0xff]  ;;  %v581_v48 = vld [vmem:[#allocation12 + $0x18] sm:$0xff]  ;;  %v303_v49 = vld [vmem:[#allocation10 + $0x60] sm:$0xff] }
  0x65   :  { %1066 = vmatpush3.bf16.msra.mxu0 %v1063_v8  ;;  %1094 = vmatpush3.bf16.msra.mxu1 %v1091_v20  ;;  %v304_v50 = vld [vmem:[#allocation10 + $0x68] sm:$0xff]  ;;  %v112_v52 = vld [vmem:[#allocation4 + $0x10] sm:$0xff]  ;;  %v1123_v53 = vpack.c.bf16 %v581_v48, %v580_v47  ;;  %v582_v55 = vld [vmem:[#allocation12 + $0x20] sm:$0xff] }
  0x66   :  { %1068 = vmatprep.subr.bf16.mxu0 %v1067_v12  ;;  %1096 = vmatprep.subr.bf16.mxu1 %v1095_v26  ;;  %v111_v51 = vld [vmem:[#allocation4 + $0x8] sm:$0xff]  ;;  %v1111_v54 = vpack.c.bf16 %v304_v50, %v303_v49  ;;  %v305_v57 = vld [vmem:[#allocation10 + $0x70] sm:$0xff]  ;;  %v306_v58 = vld [vmem:[#allocation10 + $0x78] sm:$0xff] }
  0x67   :  { %v583_v56 = vld [vmem:[#allocation12 + $0x28] sm:$0xff]  ;;  %v113_v59 = vld [vmem:[#allocation4 + $0x18] sm:$0xff]  ;;  %v114_v60 = vld [vmem:[#allocation4 + $0x20] sm:$0xff]  ;;  %v1115_v62 = vpack.c.bf16 %v306_v58, %v305_v57 }
  0x68   :  { %v1127_v61 = vpack.c.bf16 %v583_v56, %v582_v55  ;;  %v584_v63 = vld [vmem:[#allocation12 + $0x30] sm:$0xff]  ;;  %v585_v0 = vld [vmem:[#allocation12 + $0x38] sm:$0xff]  ;;  %v115_v1 = vld [vmem:[#allocation4 + $0x28] sm:$0xff] }
  0x69   :  { %1070 = vmatpush3.bf16.msra.mxu0 %v1067_v12  ;;  %1098 = vmatpush3.bf16.msra.mxu1 %v1095_v26  ;;  %v116_v2 = vld [vmem:[#allocation4 + $0x30] sm:$0xff]  ;;  %v1131_v3 = vpack.c.bf16 %v585_v0, %v584_v63  ;;  %v586_v4 = vld [vmem:[#allocation12 + $0x40] sm:$0xff]  ;;  %v587_v5 = vld [vmem:[#allocation12 + $0x48] sm:$0xff] }
  0x6a   :  { %1072 = vmatprep.subr.bf16.mxu0 %v1071_v21  ;;  %1100 = vmatprep.subr.bf16.mxu1 %v1099_v33  ;;  %v276_v6 = vld [vmem:[#allocation9 + $0x8] sm:$0xff]  ;;  %v117_v7 = vld [vmem:[#allocation4 + $0x38] sm:$0xff]  ;;  %v118_v8 = vld [vmem:[#allocation4 + $0x40] sm:$0xff]  ;;  %v1135_v9 = vpack.c.bf16 %v587_v5, %v586_v4 }
  0x6b   :  { %v277_v10 = vld [vmem:[#allocation9 + $0x10] sm:$0xff]  ;;  %v589_v12 = vld [vmem:[#allocation12 + $0x58] sm:$0xff]  ;;  %v119_v14 = vld [vmem:[#allocation4 + $0x48] sm:$0xff] }
  0x6c   :  { %v588_v11 = vld [vmem:[#allocation12 + $0x50] sm:$0xff]  ;;  %v278_v13 = vld [vmem:[#allocation9 + $0x18] sm:$0xff]  ;;  %v279_v17 = vld [vmem:[#allocation9 + $0x20] sm:$0xff] }
  0x6d   :  { %1074 = vmatpush3.bf16.msra.mxu0 %v1071_v21  ;;  %1102 = vmatpush3.bf16.msra.mxu1 %v1099_v33  ;;  %v120_v15 = vld [vmem:[#allocation4 + $0x50] sm:$0xff]  ;;  %v1139_v16 = vpack.c.bf16 %v589_v12, %v588_v11  ;;  %v590_v18 = vld [vmem:[#allocation12 + $0x60] sm:$0xff]  ;;  %v591_v19 = vld [vmem:[#allocation12 + $0x68] sm:$0xff] }
  0x6e   :  { %1076 = vmatprep.subr.bf16.mxu0 %v1075_v27  ;;  %1104 = vmatprep.subr.bf16.mxu1 %v1103_v39  ;;  %v280_v20 = vld [vmem:[#allocation9 + $0x28] sm:$0xff]  ;;  %v121_v21 = vld [vmem:[#allocation4 + $0x58] sm:$0xff]  ;;  %v122_v22 = vld [vmem:[#allocation4 + $0x60] sm:$0xff]  ;;  %v1143_v23 = vpack.c.bf16 %v591_v19, %v590_v18 }
  0x6f   :  { %v281_v24 = vld [vmem:[#allocation9 + $0x30] sm:$0xff]  ;;  %v593_v26 = vld [vmem:[#allocation12 + $0x78] sm:$0xff]  ;;  %v123_v28 = vld [vmem:[#allocation4 + $0x68] sm:$0xff] }
  0x70   :  { %v592_v25 = vld [vmem:[#allocation12 + $0x70] sm:$0xff]  ;;  %v125_v31 = vld [vmem:[#allocation4 + $0x78] sm:$0xff]  ;;  %v283_v32 = vld [vmem:[#allocation9 + $0x40] sm:$0xff] }
  0x71   :  { %1078 = vmatpush3.bf16.msra.mxu0 %v1075_v27  ;;  %1106 = vmatpush3.bf16.msra.mxu1 %v1103_v39  ;;  %v282_v27 = vld [vmem:[#allocation9 + $0x38] sm:$0xff]  ;;  %v124_v29 = vld [vmem:[#allocation4 + $0x70] sm:$0xff]  ;;  %v1147_v30 = vpack.c.bf16 %v593_v26, %v592_v25  ;;  %v284_v33 = vld [vmem:[#allocation9 + $0x48] sm:$0xff] }
  0x72   :  { %1080 = vmatprep.subr.bf16.mxu0 %v1079_v34  ;;  %1108 = vmatprep.subr.bf16.mxu1 %v1107_v45  ;;  %v286_v35 = vld [vmem:[#allocation9 + $0x58] sm:$0xff]  ;;  %v287_v36 = vld [vmem:[#allocation9 + $0x60] sm:$0xff]  ;;  %v288_v37 = vld [vmem:[#allocation9 + $0x68] sm:$0xff] }
  0x73   :  { %v289_v38 = vld [vmem:[#allocation9 + $0x70] sm:$0xff]  ;;  %v290_v39 = vld [vmem:[#allocation9 + $0x78] sm:$0xff]  ;;  %v790_v0 = vld [vmem:[%s1502_s5] ss:$0 sm:$0xff]  ;;  %s1354_s5 = smov [#allocation13]  }
  0x74   :  { %s776_s3 = sshll.u32 %s1354_s5, 4  ;;  %s777_s3 = int_to_ptr.vmem [resolvable:$true] %s776_s3 }
  0x75   :  { %1082 = vmatpush3.bf16.msra.mxu0 %v1079_v34  ;;  %1110 = vmatpush3.bf16.msra.mxu1 %v1107_v45  ;;  %v285_v34 = vld [vmem:[#allocation9 + $0x50] sm:$0xff]  ;;  %s1317_s24 = scalar_lea.vmem %s777_s3, 2048  ;;  %p1322_p13 = scmp.lt.s32.totalorder %s777_s3, %s777_s3 }
  0x76   :  { %1084 = vmatprep.subr.bf16.mxu0 %v1083_v40  ;;  %1112 = vmatprep.subr.bf16.mxu1 %v1111_v54  ;;  %p1318_p12 = scmp.ne.s32.totalorder %s777_s3, %s1317_s24  ;;  %p1323_p0 = scmp.lt.s32.totalorder %s1317_s24, %s1317_s24 }
  0x78   :  { %p1324_p1 = por %p1323_p0, %p1322_p13 }
  0x79   :  { %1086 = vmatpush3.bf16.msra.mxu0 %v1083_v40  ;;  %1114 = vmatpush3.bf16.msra.mxu1 %v1111_v54 }
  0x7a   :  { %1120 = vmatprep.subr.bf16.mxu0 %v1119_v46  ;;  %1116 = vmatprep.subr.bf16.mxu1 %v1115_v62  ;;  %p1325_p2 = pnand %p1324_p1, %p1318_p12 }
  0x7c   :  { %920 = vmatmul.mubr.f32.vlgmr.msra.gmra.mrb[0].mxu0 %v111_v51 }
  0x7d   :  { %922 = vmatprep.mubr.f32.mxu0 %v112_v52  ;;  %1122 = vmatpush3.bf16.msra.mxu0 %v1119_v46 }
  0x7e   :  { %1124 = vmatprep.subr.bf16.mxu0 %v1123_v53  ;;  %1118 = vmatpush3.bf16.msra.mxu1 %v1115_v62 }
  0x7f   :  { %1151 = vmatprep.subr.bf16.mxu1 %v1119_v46 }
  0x80   :  { %923 = vmatmul.mubr.f32.gmra.mrb[2].mxu0 %v113_v59 }
  0x81   :  { %925 = vmatprep.mubr.f32.mxu0 %v114_v60  ;;  %1126 = vmatpush3.bf16.msra.mxu0 %v1123_v53 }
  0x82   :  { %1128 = vmatprep.subr.bf16.mxu0 %v1127_v61  ;;  %976 = vmatmul.mubr.f32.vlgmr.msra.gmra.mrb[0].mxu1 %v276_v6 }
  0x83   :  { %1159 = vmatpush3.bf16.msra.mxu1 %v1119_v46  ;;  %978 = vmatprep.mubr.f32.mxu1 %v277_v10 }
  0x84   :  { %926 = vmatmul.mubr.f32.gmra.mrb[4].mxu0 %v115_v1  ;;  %1152 = vmatprep.subr.bf16.mxu1 %v1123_v53 }
  0x85   :  { %928 = vmatprep.mubr.f32.mxu0 %v116_v2  ;;  %1130 = vmatpush3.bf16.msra.mxu0 %v1127_v61 }
  0x86   :  { %1132 = vmatprep.subr.bf16.mxu0 %v1131_v3  ;;  %979 = vmatmul.mubr.f32.gmra.mrb[2].mxu1 %v278_v13 }
  0x87   :  { %1160 = vmatpush3.bf16.msra.mxu1 %v1123_v53  ;;  %981 = vmatprep.mubr.f32.mxu1 %v279_v17 }
  0x88   :  { %929 = vmatmul.mubr.f32.gmra.mrb[6].mxu0 %v117_v7  ;;  %1153 = vmatprep.subr.bf16.mxu1 %v1127_v61 }
  0x89   :  { %931 = vmatprep.mubr.f32.mxu0 %v118_v8  ;;  %1134 = vmatpush3.bf16.msra.mxu0 %v1131_v3 }
  0x8a   :  { %1136 = vmatprep.subr.bf16.mxu0 %v1135_v9  ;;  %982 = vmatmul.mubr.f32.gmra.mrb[4].mxu1 %v280_v20 }
  0x8b   :  { %1161 = vmatpush3.bf16.msra.mxu1 %v1127_v61  ;;  %984 = vmatprep.mubr.f32.mxu1 %v281_v24 }
  0x8c   :  { %932 = vmatmul.mubr.f32.gmra.mrb[8].mxu0 %v119_v14  ;;  %1154 = vmatprep.subr.bf16.mxu1 %v1131_v3 }
  0x8d   :  { %934 = vmatprep.mubr.f32.mxu0 %v120_v15  ;;  %1138 = vmatpush3.bf16.msra.mxu0 %v1135_v9 }
  0x8e   :  { %1140 = vmatprep.subr.bf16.mxu0 %v1139_v16  ;;  %985 = vmatmul.mubr.f32.gmra.mrb[6].mxu1 %v282_v27 }
  0x8f   :  { %1162 = vmatpush3.bf16.msra.mxu1 %v1131_v3  ;;  %987 = vmatprep.mubr.f32.mxu1 %v283_v32 }
  0x90   :  { %935 = vmatmul.mubr.f32.gmra.mrb[10].mxu0 %v121_v21  ;;  %1155 = vmatprep.subr.bf16.mxu1 %v1135_v9 }
  0x91   :  { %937 = vmatprep.mubr.f32.mxu0 %v122_v22  ;;  %1142 = vmatpush3.bf16.msra.mxu0 %v1139_v16 }
  0x92   :  { %1144 = vmatprep.subr.bf16.mxu0 %v1143_v23  ;;  %988 = vmatmul.mubr.f32.gmra.mrb[8].mxu1 %v284_v33 }
  0x93   :  { %1163 = vmatpush3.bf16.msra.mxu1 %v1135_v9  ;;  %990 = vmatprep.mubr.f32.mxu1 %v285_v34 }
  0x94   :  { %938 = vmatmul.mubr.f32.gmra.mrb[12].mxu0 %v123_v28  ;;  %1156 = vmatprep.subr.bf16.mxu1 %v1139_v16 }
  0x95   :  { %940 = vmatprep.mubr.f32.mxu0 %v124_v29  ;;  %1146 = vmatpush3.bf16.msra.mxu0 %v1143_v23 }
  0x96   :  { %1148 = vmatprep.subr.bf16.mxu0 %v1147_v30  ;;  %991 = vmatmul.mubr.f32.gmra.mrb[10].mxu1 %v286_v35 }
  0x97   :  { %1164 = vmatpush3.bf16.msra.mxu1 %v1139_v16  ;;  %993 = vmatprep.mubr.f32.mxu1 %v287_v36 }
  0x98   :  { %941 = vmatmul.mubr.f32.gmra.mrb[14].mxu0 %v125_v31  ;;  %1157 = vmatprep.subr.bf16.mxu1 %v1143_v23 }
  0x99   :  { %1150 = vmatpush3.bf16.msra.mxu0 %v1147_v30 }
  0x9a   :  { %994 = vmatmul.mubr.f32.gmra.mrb[12].mxu1 %v288_v37 }
  0x9b   :  { %1165 = vmatpush3.bf16.msra.mxu1 %v1143_v23  ;;  %996 = vmatprep.mubr.f32.mxu1 %v289_v38 }
  0x9c   :  { %1158 = vmatprep.subr.bf16.mxu1 %v1147_v30 }
  0x9e   :  { %997 = vmatmul.mubr.f32.gmra.mrb[14].mxu1 %v290_v39 }
  0x9f   :  { %1166 = vmatpush3.bf16.msra.mxu1 %v1147_v30 }
 0x14f   :  { %v921_v40 = vpop.f32.mrb[0].mxu0 }
 0x150   :  { %v192_v41 = vpop.f32.mrb[1].mxu0 }
 0x151   :  { %1031 = vmatprep.mubr.f32.mxu0 %v192_v41 }
 0x152   :  { %1032 = vmatmul.mubr.f32.vlgmr.msra.gmra.mrb[16].mxu0 %v921_v40 }
 0x153   :  { %v924_v42 = vpop.f32.mrb[2].mxu0 }
 0x154   :  { %v202_v43 = vpop.f32.mrb[3].mxu0 }
 0x155   :  { %1034 = vmatprep.mubr.f32.mxu0 %v202_v43  ;;  %v977_v46 = vpop.f32.mrb[0].mxu1 }
 0x156   :  { %1035 = vmatmul.mubr.f32.gmra.mrb[18].mxu0 %v924_v42  ;;  %v380_v48 = vpop.f32.mrb[1].mxu1  ;;  %v386_v1 = vadd.f32 %v977_v46, %v790_v0 }
 0x157   :  { %v927_v44 = vpop.f32.mrb[4].mxu0  ;;  %v381_v2 = vadd.f32 %v790_v0, %v380_v48 }
 0x158   :  { %v212_v45 = vpop.f32.mrb[5].mxu0 }
 0x159   :  { %1037 = vmatprep.mubr.f32.mxu0 %v212_v45  ;;  %v980_v50 = vpop.f32.mrb[2].mxu1 }
 0x15a   :  { %1038 = vmatmul.mubr.f32.gmra.mrb[20].mxu0 %v927_v44  ;;  %v390_v52 = vpop.f32.mrb[3].mxu1  ;;  %v396_v7 = vadd.f32 %v980_v50, %v790_v0 }
 0x15b   :  { %v930_v47 = vpop.f32.mrb[6].mxu0  ;;  %v391_v8 = vadd.f32 %v790_v0, %v390_v52 }
 0x15c   :  { %v222_v49 = vpop.f32.mrb[7].mxu0 }
 0x15d   :  { %1040 = vmatprep.mubr.f32.mxu0 %v222_v49  ;;  %v983_v54 = vpop.f32.mrb[4].mxu1 }
 0x15e   :  { %1041 = vmatmul.mubr.f32.gmra.mrb[22].mxu0 %v930_v47  ;;  %v400_v56 = vpop.f32.mrb[5].mxu1  ;;  %v406_v13 = vadd.f32 %v983_v54, %v790_v0 }
 0x15f   :  { %v933_v51 = vpop.f32.mrb[8].mxu0  ;;  %v401_v14 = vadd.f32 %v790_v0, %v400_v56 }
 0x160   :  { %v232_v53 = vpop.f32.mrb[9].mxu0 }
 0x161   :  { %1043 = vmatprep.mubr.f32.mxu1 %v232_v53  ;;  %v986_v58 = vpop.f32.mrb[6].mxu1 }
 0x162   :  { %1044 = vmatmul.mubr.f32.vlgmr.msra.gmra.mrb[8].mxu1 %v933_v51  ;;  %v410_v60 = vpop.f32.mrb[7].mxu1  ;;  %v416_v19 = vadd.f32 %v986_v58, %v790_v0 }
 0x163   :  { %v936_v55 = vpop.f32.mrb[10].mxu0  ;;  %v411_v20 = vadd.f32 %v790_v0, %v410_v60 }
 0x164   :  { %v242_v57 = vpop.f32.mrb[11].mxu0 }
 0x165   :  { %1046 = vmatprep.mubr.f32.mxu1 %v242_v57 }
 0x166   :  { %1047 = vmatmul.mubr.f32.gmra.mrb[10].mxu1 %v936_v55 }
 0x167   :  { %v939_v59 = vpop.f32.mrb[12].mxu0 }
 0x168   :  { %v252_v61 = vpop.f32.mrb[13].mxu0 }
 0x169   :  { %1049 = vmatprep.mubr.f32.mxu1 %v252_v61 }
 0x16a   :  { %1050 = vmatmul.mubr.f32.gmra.mrb[12].mxu1 %v939_v59 }
 0x16b   :  { %v942_v62 = vpop.f32.mrb[14].mxu0 }
 0x16c   :  { %v262_v63 = vpop.f32.mrb[15].mxu0 }
 0x16d   :  { %1052 = vmatprep.mubr.f32.mxu1 %v262_v63 }
 0x16e   :  { %1053 = vmatmul.mubr.f32.gmra.mrb[14].mxu1 %v942_v62 }
 0x225   :  { %v1033_v3 = vpop.f32.mrb[16].mxu0 }
 0x226   :  { %v740_v4 = vadd.f32 %v1033_v3, %v386_v1  ;;  %v660_v5 = vpop.f32.mrb[17].mxu0 }
 0x227   :  { %v739_v6 = vadd.f32 %v660_v5, %v381_v2 }
 0x228   :  { %756 = vst [vmem:[#allocation13 + $0x8] sm:$0xff] %v740_v4 }
 0x229   :  { %755 = vst [vmem:[#allocation13] sm:$0xff] %v739_v6  ;;  %v1036_v9 = vpop.f32.mrb[18].mxu0 }
 0x22a   :  { %v742_v10 = vadd.f32 %v1036_v9, %v396_v7  ;;  %v670_v11 = vpop.f32.mrb[19].mxu0 }
 0x22b   :  { %v741_v12 = vadd.f32 %v670_v11, %v391_v8 }
 0x22c   :  { %758 = vst [vmem:[#allocation13 + $0x18] sm:$0xff] %v742_v10 }
 0x22d   :  { %757 = vst [vmem:[#allocation13 + $0x10] sm:$0xff] %v741_v12  ;;  %v1039_v15 = vpop.f32.mrb[20].mxu0 }
 0x22e   :  { %v744_v16 = vadd.f32 %v1039_v15, %v406_v13  ;;  %v680_v17 = vpop.f32.mrb[21].mxu0 }
 0x22f   :  { %v743_v18 = vadd.f32 %v680_v17, %v401_v14 }
 0x230   :  { %760 = vst [vmem:[#allocation13 + $0x28] sm:$0xff] %v744_v16 }
 0x231   :  { %759 = vst [vmem:[#allocation13 + $0x20] sm:$0xff] %v743_v18  ;;  %v1042_v21 = vpop.f32.mrb[22].mxu0 }
 0x232   :  { %v746_v22 = vadd.f32 %v1042_v21, %v416_v19  ;;  %v690_v23 = vpop.f32.mrb[23].mxu0 }
 0x233   :  { %v745_v24 = vadd.f32 %v690_v23, %v411_v20 }
 0x234   :  { %762 = vst [vmem:[#allocation13 + $0x38] sm:$0xff] %v746_v22 }
 0x235   :  { %761 = vst [vmem:[#allocation13 + $0x30] sm:$0xff] %v745_v24  ;;  %v1045_v25 = vpop.f32.mrb[8].mxu1 }
 0x236   :  { %v1183_v26 = vadd.f32 %v1045_v25, %v790_v0  ;;  %v700_v27 = vpop.f32.mrb[9].mxu1 }
 0x237   :  { %v1184_v28 = vadd.f32 %v790_v0, %v700_v27 }
 0x238   :  { %764 = vst [vmem:[#allocation13 + $0x48] sm:$0xff] %v1183_v26 }
 0x239   :  { %763 = vst [vmem:[#allocation13 + $0x40] sm:$0xff] %v1184_v28  ;;  %v1048_v29 = vpop.f32.mrb[10].mxu1 }
 0x23a   :  { %v1185_v30 = vadd.f32 %v1048_v29, %v790_v0  ;;  %v710_v31 = vpop.f32.mrb[11].mxu1 }
 0x23b   :  { %v1186_v32 = vadd.f32 %v790_v0, %v710_v31 }
 0x23c   :  { %766 = vst [vmem:[#allocation13 + $0x58] sm:$0xff] %v1185_v30 }
 0x23d   :  { %765 = vst [vmem:[#allocation13 + $0x50] sm:$0xff] %v1186_v32  ;;  %v1051_v33 = vpop.f32.mrb[12].mxu1 }
 0x23e   :  { %v1187_v34 = vadd.f32 %v1051_v33, %v790_v0  ;;  %v720_v35 = vpop.f32.mrb[13].mxu1 }
 0x23f   :  { %v1188_v36 = vadd.f32 %v790_v0, %v720_v35 }
 0x240   :  { %768 = vst [vmem:[#allocation13 + $0x68] sm:$0xff] %v1187_v34 }
 0x241   :  { %767 = vst [vmem:[#allocation13 + $0x60] sm:$0xff] %v1188_v36  ;;  %v1054_v37 = vpop.f32.mrb[14].mxu1 }
 0x242   :  { %v1189_v38 = vadd.f32 %v1054_v37, %v790_v0  ;;  %v730_v39 = vpop.f32.mrb[15].mxu1 }
 0x243   :  { %v1190_v40 = vadd.f32 %v790_v0, %v730_v39 }
 0x244   :  { %770 = vst [vmem:[#allocation13 + $0x78] sm:$0xff] %v1189_v38 }
 0x245   :  { %769 = vst [vmem:[#allocation13 + $0x70] sm:$0xff] %v1190_v40 }
 0x246   :  { %1328 = shalt.err (!%p1325_p2)
}
 0x247   :  { %s1329_s14 = scalar_lea.hbm %s1503_s6, 2048 }
 0x248   :  { %p1330_p3 = scmp.ne.s32.totalorder %s1503_s6, %s1329_s14  ;;  %p1333_p4 = scmp.lt.u32.totalorder %s1329_s14, %s1503_s6 }
 0x24a   :  { %p1335_p5 = pnand %p1333_p4, %p1330_p3 }
 0x24c   :  { %1338 = shalt.err (!%p1335_p5)
}
 0x24d   :  { %782 = dma.vmem_to_hbm [thread:$0]  %s777_s3, 2048, %s1503_s6, [#allocation6], %s1349_s9, %s1349_s9, %s1350_s10  }
 0x24e   :  { %1345 = dma.done.wait [#allocation6], 2048  }
 0x24f   :  { %1346 = vsyncadd [#allocation6], 4294965248 }
 0x250   :  { %786 = vsyncpa [#allocation5], 1 }
 0x251   :  { %787 = vsyncpa [#allocation8], 1 }
 0x252   :  { %788 = vsyncpa [#allocation11], 1 }
 0x253   :  { %789 = vsyncpa [#allocation6], 1 }

</bundles_post_ra>
